<compile_context>
chip_gen: v6e
topology: v6e:2x2x1
jax: 0.10.0
libtpu: 0.0.40
codegen_flags: <defaults>
</compile_context>

<pallas_src>
from functools import partial

import jax
import jax.numpy as jnp
import numpy as np
from jax.experimental import pallas as pl
from jax.experimental.pallas import tpu as pltpu


# ----------------------------------------------------------------------------
# Fused kernel
# ----------------------------------------------------------------------------
def _fused_bottleneck_matmul_kernel(
    a1_ref,   # (4*Ho*Ho, Cin)    bf16  parity-reordered input pixels
    w1_ref,   # (Cin, Cmid)       bf16  conv1 weight * bn1 scale
    b1_ref,   # (1, Cmid)         f32   bn1 bias
    m_ref,    # (9, Ho*Ho, Ho*Ho) bf16  0/1 shift matrices per 3x3 tap
    w2_ref,   # (9, Cmid, Cmid)   bf16  conv2 tap weights * bn2 scale
    b2_ref,   # (1, Cmid)         f32   bn2 bias
    w3_ref,   # (Cmid, Cout)      bf16  conv3 weight * bn3 scale
    wd_ref,   # (Cin, Cout)       bf16  downsample weight * bn_d scale
    b3d_ref,  # (1, Cout)         f32   bn3 bias + bn_d bias
    y_ref,    # (Ho*Ho, Cout)     f32   y[i*Ho+k, c] = (x @ x)[c, i, k]
    *, ho):
    hw = ho * ho

    # conv1 (1x1) + bn1 + relu
    a1 = a1_ref[...]
    o1 = jnp.dot(a1, w1_ref[...], preferred_element_type=jnp.float32)
    o1 = jnp.maximum(o1 + b1_ref[...], 0.0).astype(jnp.bfloat16)

    # conv2 (3x3, stride 2, pad 1) + bn2 + relu : 9 shift-matmul taps
    cmid = w2_ref.shape[2]
    acc2 = jnp.zeros((hw, cmid), jnp.float32)
    for kh in range(3):
        for kw in range(3):
            k = kh * 3 + kw
            rp = 0 if kh == 1 else 1          # row parity group of this tap
            cp = 0 if kw == 1 else 1          # col parity group of this tap
            g = rp * 2 + cp
            o1_g = o1[g * hw:(g + 1) * hw, :]                        # (hw, Cmid)
            sel = jnp.dot(m_ref[k], o1_g,
                          preferred_element_type=jnp.float32).astype(jnp.bfloat16)
            acc2 = acc2 + jnp.dot(sel, w2_ref[k],
                                  preferred_element_type=jnp.float32)
    o2 = jnp.maximum(acc2 + b2_ref[...], 0.0).astype(jnp.bfloat16)

    # conv3+bn3 fused with downsample(1x1 s2)+bn and the residual add, then ReLU
    xd = a1_ref[0:hw, :]                       # x at even (h, w) = downsample input
    acc3 = jnp.dot(o2, w3_ref[...], preferred_element_type=jnp.float32)
    acc3 = acc3 + jnp.dot(xd, wd_ref[...], preferred_element_type=jnp.float32)
    r = jnp.maximum(acc3 + b3d_ref[...], 0.0)   # (hw, Cout) f32, channels on lanes

    # torch.matmul(x, x) over (Ho, Wo):  y[(i,k), c] = sum_j r[(i,j), c] * r[(j,k), c]
    rows = []
    for i in range(ho):
        yi = jnp.zeros((ho, r.shape[1]), jnp.float32)
        for j in range(ho):
            yi = yi + r[i * ho + j:i * ho + j + 1, :] * r[j * ho:(j + 1) * ho, :]
        rows.append(yi)
    y_ref[...] = jnp.concatenate(rows, axis=0)


# ----------------------------------------------------------------------------
# Wrapper (layout permutation + pallas_call)
# ----------------------------------------------------------------------------
def _shift_matrix(d, n):
    # P[oi, a] = 1 iff grid index a contributes to output index oi for a tap
    # displaced by d in {-1, 0, +1}; d == -1 injects the pad=1 zero border.
    if d == -1:
        return np.diag(np.ones(n - 1, np.float32), -1)
    return np.eye(n, dtype=np.float32)


def bottleneck_matmul_forward(x_nchw, p):
    # dropout(p=0, training=False) is the identity.
    N, Cin, H, W = x_nchw.shape
    assert N == 1 and H == W and H % 2 == 0
    Ho = H // 2
    Cout = p["w3s"].shape[1]

    # NCHW -> rows ordered (h parity, w parity, h//2, w//2), channels on lanes.
    x = jnp.transpose(x_nchw, (0, 2, 3, 1)).reshape(Ho, 2, Ho, 2, Cin)
    a1 = jnp.transpose(x, (1, 3, 0, 2, 4)).reshape(4 * Ho * Ho, Cin)
    a1 = a1.astype(jnp.bfloat16)

    # 0/1 shift matrices for the 9 taps of the 3x3 stride-2 conv (k = kh*3+kw).
    m = np.stack([np.kron(_shift_matrix(kh - 1, Ho), _shift_matrix(kw - 1, Ho))
                  for kh in range(3) for kw in range(3)], axis=0)
    m = jnp.asarray(m, jnp.bfloat16)

    vmem = pl.BlockSpec(memory_space=pltpu.MemorySpace.VMEM)
    y = pl.pallas_call(
        partial(_fused_bottleneck_matmul_kernel, ho=Ho),
        out_shape=jax.ShapeDtypeStruct((Ho * Ho, Cout), jnp.float32),
        in_specs=[vmem] * 9,
        out_specs=vmem,
    )(a1, p["w1s"], p["b1"], m, p["w2s"], p["b2"], p["w3s"], p["wds"], p["b3d"])

    # rows of y are (i, k) of the spatial matmul; back to NCHW.
    return jnp.transpose(y.reshape(Ho, Ho, Cout), (2, 0, 1))[None]


# ----------------------------------------------------------------------------
# Deterministic parameter init (synthetic weights; BN is eval-mode & folded)
# ----------------------------------------------------------------------------
def init_params(key):
    eps = 1e-5
    ks = jax.random.split(key, 8)

    def bn_params(k, c):
        k1, k2, k3, k4 = jax.random.split(k, 4)
        gamma = 1.0 + 0.2 * jax.random.uniform(k1, (c,), minval=-1.0, maxval=1.0)
        beta = 0.1 * jax.random.normal(k2, (c,))
        mean = 0.1 * jax.random.normal(k3, (c,))
        var = 0.5 + jax.random.uniform(k4, (c,), minval=0.0, maxval=1.0)
        return gamma, beta, mean, var

    def fold(g, b, m, v):
        s = g / jnp.sqrt(v + eps)
        return s, b - m * s

    w1 = 0.10 * jax.random.normal(ks[0], (64, 16, 1, 1), jnp.float32)   # conv1 (OIHW)
    w2 = 0.05 * jax.random.normal(ks[1], (64, 64, 3, 3), jnp.float32)   # conv2
    w3 = 0.05 * jax.random.normal(ks[2], (256, 64, 1, 1), jnp.float32)  # conv3
    wd = 0.10 * jax.random.normal(ks[3], (256, 16, 1, 1), jnp.float32)  # downsample

    bn1 = bn_params(ks[4], 64)
    bn2 = bn_params(ks[5], 64)
    bn3 = bn_params(ks[6], 256)
    bnd = bn_params(ks[7], 256)

    s1, b1 = fold(*bn1)
    s2, b2 = fold(*bn2)
    s3, b3 = fold(*bn3)
    sd, bd = fold(*bnd)

    bf16 = jnp.bfloat16
    params = dict(
        # BN scales folded into the weights (bf16 for the MXU); biases stay f32.
        w1s=(w1.reshape(64, 16).T * s1[None, :]).astype(bf16),                     # (16, 64)
        w2s=jnp.stack([w2[:, :, kh, kw].T * s2[None, :]
                       for kh in range(3) for kw in range(3)], 0).astype(bf16),    # (9, 64, 64)
        w3s=(w3.reshape(256, 64).T * s3[None, :]).astype(bf16),                    # (64, 256)
        wds=(wd.reshape(256, 16).T * sd[None, :]).astype(bf16),                    # (16, 256)
        b1=b1.reshape(1, 64).astype(jnp.float32),
        b2=b2.reshape(1, 64).astype(jnp.float32),
        b3d=(b3 + bd).reshape(1, 256).astype(jnp.float32),
    )
    raw = dict(w1=w1, w2=w2, w3=w3, wd=wd, bn1=bn1, bn2=bn2, bn3=bn3, bnd=bnd)
    return params, raw


# Pure-JAX reference (mirrors the torch forward in NCHW) for a sanity check.
def reference_forward(x_nchw, raw):
    eps = 1e-5

    def bn(x, g, b, m, v):
        s = g / jnp.sqrt(v + eps)
        return x * s[None, :, None, None] + (b - m * s)[None, :, None, None]

    def conv(x, w, stride, pad):
        return jax.lax.conv_general_dilated(
            x, w, (stride, stride), ((pad, pad), (pad, pad)),
            dimension_numbers=("NCHW", "OIHW", "NCHW"))

    v = x_nchw                                         # dropout p=0, eval: identity
    out = jax.nn.relu(bn(conv(v, raw["w1"], 1, 0), *raw["bn1"]))
    out = jax.nn.relu(bn(conv(out, raw["w2"], 2, 1), *raw["bn2"]))
    out = bn(conv(out, raw["w3"], 1, 0), *raw["bn3"])
    ident = bn(conv(v, raw["wd"], 2, 0), *raw["bnd"])
    x = jax.nn.relu(out + ident)
    return jnp.matmul(x, x)


if __name__ == "__main__":
    key = jax.random.PRNGKey(0)
    kx, kp = jax.random.split(key)

    # Input follows PyTorch NCHW; channels=16 fixed by the module, spatial 8x8 -> 4x4.
    x1 = jax.random.normal(kx, (1, 16, 8, 8), jnp.float32)
    params, raw = init_params(kp)

    fwd = jax.jit(lambda x: bottleneck_matmul_forward(x, params))
    y = jax.block_until_ready(fwd(x1))
    assert y.shape == (1, 256, 4, 4)

    y_ref = jax.block_until_ready(reference_forward(x1, raw))
    np.testing.assert_allclose(np.asarray(y), np.asarray(y_ref), rtol=5e-2, atol=5e-2)

    print("KERNEL_OK")
</pallas_src>

<mosaic_0001>
module attributes {stable_mosaic.version = 11 : i64} {
  func.func @_fused_bottleneck_matmul_kernel(%arg0: memref<64x16xbf16, #tpu.memory_space<vmem>>, %arg1: memref<16x64xbf16, #tpu.memory_space<vmem>>, %arg2: memref<1x64xf32, #tpu.memory_space<vmem>>, %arg3: memref<9x16x16xbf16, #tpu.memory_space<vmem>>, %arg4: memref<9x64x64xbf16, #tpu.memory_space<vmem>>, %arg5: memref<1x64xf32, #tpu.memory_space<vmem>>, %arg6: memref<64x256xbf16, #tpu.memory_space<vmem>>, %arg7: memref<16x256xbf16, #tpu.memory_space<vmem>>, %arg8: memref<1x256xf32, #tpu.memory_space<vmem>>, %arg9: memref<16x256xf32, #tpu.memory_space<vmem>>) attributes {dimension_semantics = [], scalar_prefetch = 0 : i64, scratch_operands = 0 : i64, tpu.core_type = #tpu.core_type<tc>} {
    %c0 = arith.constant 0 : index
    %c0_0 = arith.constant 0 : index
    %0 = vector.load %arg0[%c0, %c0_0] : memref<64x16xbf16, #tpu.memory_space<vmem>>, vector<64x16xbf16>
    %c0_1 = arith.constant 0 : index
    %c0_2 = arith.constant 0 : index
    %1 = vector.load %arg1[%c0_1, %c0_2] : memref<16x64xbf16, #tpu.memory_space<vmem>>, vector<16x64xbf16>
    %cst = arith.constant dense<0.000000e+00> : vector<64x64xf32>
    %2 = tpu.matmul %0, %1, %cst {dimension_numbers = #tpu.dot_dimension_numbers<[1], [0], [0], [1], [0, 0, 1, 1], [], []>} : vector<64x16xbf16>, vector<16x64xbf16>, vector<64x64xf32> -> vector<64x64xf32>
    %c0_3 = arith.constant 0 : index
    %c0_4 = arith.constant 0 : index
    %3 = vector.load %arg2[%c0_3, %c0_4] : memref<1x64xf32, #tpu.memory_space<vmem>>, vector<1x64xf32>
    %4 = vector.broadcast %3 : vector<1x64xf32> to vector<64x64xf32>
    %5 = arith.addf %2, %4 : vector<64x64xf32>
    %cst_5 = arith.constant 0.000000e+00 : f32
    %6 = vector.broadcast %cst_5 : f32 to vector<64x64xf32>
    %7 = arith.maximumf %5, %6 : vector<64x64xf32>
    %8 = arith.truncf %7 : vector<64x64xf32> to vector<64x64xbf16>
    %cst_6 = arith.constant 0.000000e+00 : f32
    %9 = vector.broadcast %cst_6 : f32 to vector<16x64xf32>
    %10 = vector.extract_strided_slice %8 {offsets = [48, 0], sizes = [16, 64], strides = [1, 1]} : vector<64x64xbf16> to vector<16x64xbf16>
    %c0_7 = arith.constant 0 : index
    %c0_8 = arith.constant 0 : index
    %c0_9 = arith.constant 0 : index
    %11 = vector.load %arg3[%c0_7, %c0_8, %c0_9] : memref<9x16x16xbf16, #tpu.memory_space<vmem>>, vector<1x16x16xbf16>
    %12 = vector.shape_cast %11 : vector<1x16x16xbf16> to vector<16x16xbf16>
    %cst_10 = arith.constant dense<0.000000e+00> : vector<16x64xf32>
    %13 = tpu.matmul %12, %10, %cst_10 {dimension_numbers = #tpu.dot_dimension_numbers<[1], [0], [0], [1], [0, 0, 1, 1], [], []>} : vector<16x16xbf16>, vector<16x64xbf16>, vector<16x64xf32> -> vector<16x64xf32>
    %14 = arith.truncf %13 : vector<16x64xf32> to vector<16x64xbf16>
    %c0_11 = arith.constant 0 : index
    %c0_12 = arith.constant 0 : index
    %c0_13 = arith.constant 0 : index
    %15 = vector.load %arg4[%c0_11, %c0_12, %c0_13] : memref<9x64x64xbf16, #tpu.memory_space<vmem>>, vector<1x64x64xbf16>
    %16 = vector.shape_cast %15 : vector<1x64x64xbf16> to vector<64x64xbf16>
    %cst_14 = arith.constant dense<0.000000e+00> : vector<16x64xf32>
    %17 = tpu.matmul %14, %16, %cst_14 {dimension_numbers = #tpu.dot_dimension_numbers<[1], [0], [0], [1], [0, 0, 1, 1], [], []>} : vector<16x64xbf16>, vector<64x64xbf16>, vector<16x64xf32> -> vector<16x64xf32>
    %18 = arith.addf %9, %17 : vector<16x64xf32>
    %19 = vector.extract_strided_slice %8 {offsets = [32, 0], sizes = [16, 64], strides = [1, 1]} : vector<64x64xbf16> to vector<16x64xbf16>
    %c1 = arith.constant 1 : index
    %c0_15 = arith.constant 0 : index
    %c0_16 = arith.constant 0 : index
    %20 = vector.load %arg3[%c1, %c0_15, %c0_16] : memref<9x16x16xbf16, #tpu.memory_space<vmem>>, vector<1x16x16xbf16>
    %21 = vector.shape_cast %20 : vector<1x16x16xbf16> to vector<16x16xbf16>
    %cst_17 = arith.constant dense<0.000000e+00> : vector<16x64xf32>
    %22 = tpu.matmul %21, %19, %cst_17 {dimension_numbers = #tpu.dot_dimension_numbers<[1], [0], [0], [1], [0, 0, 1, 1], [], []>} : vector<16x16xbf16>, vector<16x64xbf16>, vector<16x64xf32> -> vector<16x64xf32>
    %23 = arith.truncf %22 : vector<16x64xf32> to vector<16x64xbf16>
    %c1_18 = arith.constant 1 : index
    %c0_19 = arith.constant 0 : index
    %c0_20 = arith.constant 0 : index
    %24 = vector.load %arg4[%c1_18, %c0_19, %c0_20] : memref<9x64x64xbf16, #tpu.memory_space<vmem>>, vector<1x64x64xbf16>
    %25 = vector.shape_cast %24 : vector<1x64x64xbf16> to vector<64x64xbf16>
    %cst_21 = arith.constant dense<0.000000e+00> : vector<16x64xf32>
    %26 = tpu.matmul %23, %25, %cst_21 {dimension_numbers = #tpu.dot_dimension_numbers<[1], [0], [0], [1], [0, 0, 1, 1], [], []>} : vector<16x64xbf16>, vector<64x64xbf16>, vector<16x64xf32> -> vector<16x64xf32>
    %27 = arith.addf %18, %26 : vector<16x64xf32>
    %28 = vector.extract_strided_slice %8 {offsets = [48, 0], sizes = [16, 64], strides = [1, 1]} : vector<64x64xbf16> to vector<16x64xbf16>
    %c2 = arith.constant 2 : index
    %c0_22 = arith.constant 0 : index
    %c0_23 = arith.constant 0 : index
    %29 = vector.load %arg3[%c2, %c0_22, %c0_23] : memref<9x16x16xbf16, #tpu.memory_space<vmem>>, vector<1x16x16xbf16>
    %30 = vector.shape_cast %29 : vector<1x16x16xbf16> to vector<16x16xbf16>
    %cst_24 = arith.constant dense<0.000000e+00> : vector<16x64xf32>
    %31 = tpu.matmul %30, %28, %cst_24 {dimension_numbers = #tpu.dot_dimension_numbers<[1], [0], [0], [1], [0, 0, 1, 1], [], []>} : vector<16x16xbf16>, vector<16x64xbf16>, vector<16x64xf32> -> vector<16x64xf32>
    %32 = arith.truncf %31 : vector<16x64xf32> to vector<16x64xbf16>
    %c2_25 = arith.constant 2 : index
    %c0_26 = arith.constant 0 : index
    %c0_27 = arith.constant 0 : index
    %33 = vector.load %arg4[%c2_25, %c0_26, %c0_27] : memref<9x64x64xbf16, #tpu.memory_space<vmem>>, vector<1x64x64xbf16>
    %34 = vector.shape_cast %33 : vector<1x64x64xbf16> to vector<64x64xbf16>
    %cst_28 = arith.constant dense<0.000000e+00> : vector<16x64xf32>
    %35 = tpu.matmul %32, %34, %cst_28 {dimension_numbers = #tpu.dot_dimension_numbers<[1], [0], [0], [1], [0, 0, 1, 1], [], []>} : vector<16x64xbf16>, vector<64x64xbf16>, vector<16x64xf32> -> vector<16x64xf32>
    %36 = arith.addf %27, %35 : vector<16x64xf32>
    %37 = vector.extract_strided_slice %8 {offsets = [16, 0], sizes = [16, 64], strides = [1, 1]} : vector<64x64xbf16> to vector<16x64xbf16>
    %c3 = arith.constant 3 : index
    %c0_29 = arith.constant 0 : index
    %c0_30 = arith.constant 0 : index
    %38 = vector.load %arg3[%c3, %c0_29, %c0_30] : memref<9x16x16xbf16, #tpu.memory_space<vmem>>, vector<1x16x16xbf16>
    %39 = vector.shape_cast %38 : vector<1x16x16xbf16> to vector<16x16xbf16>
    %cst_31 = arith.constant dense<0.000000e+00> : vector<16x64xf32>
    %40 = tpu.matmul %39, %37, %cst_31 {dimension_numbers = #tpu.dot_dimension_numbers<[1], [0], [0], [1], [0, 0, 1, 1], [], []>} : vector<16x16xbf16>, vector<16x64xbf16>, vector<16x64xf32> -> vector<16x64xf32>
    %41 = arith.truncf %40 : vector<16x64xf32> to vector<16x64xbf16>
    %c3_32 = arith.constant 3 : index
    %c0_33 = arith.constant 0 : index
    %c0_34 = arith.constant 0 : index
    %42 = vector.load %arg4[%c3_32, %c0_33, %c0_34] : memref<9x64x64xbf16, #tpu.memory_space<vmem>>, vector<1x64x64xbf16>
    %43 = vector.shape_cast %42 : vector<1x64x64xbf16> to vector<64x64xbf16>
    %cst_35 = arith.constant dense<0.000000e+00> : vector<16x64xf32>
    %44 = tpu.matmul %41, %43, %cst_35 {dimension_numbers = #tpu.dot_dimension_numbers<[1], [0], [0], [1], [0, 0, 1, 1], [], []>} : vector<16x64xbf16>, vector<64x64xbf16>, vector<16x64xf32> -> vector<16x64xf32>
    %45 = arith.addf %36, %44 : vector<16x64xf32>
    %46 = vector.extract_strided_slice %8 {offsets = [0, 0], sizes = [16, 64], strides = [1, 1]} : vector<64x64xbf16> to vector<16x64xbf16>
    %c4 = arith.constant 4 : index
    %c0_36 = arith.constant 0 : index
    %c0_37 = arith.constant 0 : index
    %47 = vector.load %arg3[%c4, %c0_36, %c0_37] : memref<9x16x16xbf16, #tpu.memory_space<vmem>>, vector<1x16x16xbf16>
    %48 = vector.shape_cast %47 : vector<1x16x16xbf16> to vector<16x16xbf16>
    %cst_38 = arith.constant dense<0.000000e+00> : vector<16x64xf32>
    %49 = tpu.matmul %48, %46, %cst_38 {dimension_numbers = #tpu.dot_dimension_numbers<[1], [0], [0], [1], [0, 0, 1, 1], [], []>} : vector<16x16xbf16>, vector<16x64xbf16>, vector<16x64xf32> -> vector<16x64xf32>
    %50 = arith.truncf %49 : vector<16x64xf32> to vector<16x64xbf16>
    %c4_39 = arith.constant 4 : index
    %c0_40 = arith.constant 0 : index
    %c0_41 = arith.constant 0 : index
    %51 = vector.load %arg4[%c4_39, %c0_40, %c0_41] : memref<9x64x64xbf16, #tpu.memory_space<vmem>>, vector<1x64x64xbf16>
    %52 = vector.shape_cast %51 : vector<1x64x64xbf16> to vector<64x64xbf16>
    %cst_42 = arith.constant dense<0.000000e+00> : vector<16x64xf32>
    %53 = tpu.matmul %50, %52, %cst_42 {dimension_numbers = #tpu.dot_dimension_numbers<[1], [0], [0], [1], [0, 0, 1, 1], [], []>} : vector<16x64xbf16>, vector<64x64xbf16>, vector<16x64xf32> -> vector<16x64xf32>
    %54 = arith.addf %45, %53 : vector<16x64xf32>
    %55 = vector.extract_strided_slice %8 {offsets = [16, 0], sizes = [16, 64], strides = [1, 1]} : vector<64x64xbf16> to vector<16x64xbf16>
    %c5 = arith.constant 5 : index
    %c0_43 = arith.constant 0 : index
    %c0_44 = arith.constant 0 : index
    %56 = vector.load %arg3[%c5, %c0_43, %c0_44] : memref<9x16x16xbf16, #tpu.memory_space<vmem>>, vector<1x16x16xbf16>
    %57 = vector.shape_cast %56 : vector<1x16x16xbf16> to vector<16x16xbf16>
    %cst_45 = arith.constant dense<0.000000e+00> : vector<16x64xf32>
    %58 = tpu.matmul %57, %55, %cst_45 {dimension_numbers = #tpu.dot_dimension_numbers<[1], [0], [0], [1], [0, 0, 1, 1], [], []>} : vector<16x16xbf16>, vector<16x64xbf16>, vector<16x64xf32> -> vector<16x64xf32>
    %59 = arith.truncf %58 : vector<16x64xf32> to vector<16x64xbf16>
    %c5_46 = arith.constant 5 : index
    %c0_47 = arith.constant 0 : index
    %c0_48 = arith.constant 0 : index
    %60 = vector.load %arg4[%c5_46, %c0_47, %c0_48] : memref<9x64x64xbf16, #tpu.memory_space<vmem>>, vector<1x64x64xbf16>
    %61 = vector.shape_cast %60 : vector<1x64x64xbf16> to vector<64x64xbf16>
    %cst_49 = arith.constant dense<0.000000e+00> : vector<16x64xf32>
    %62 = tpu.matmul %59, %61, %cst_49 {dimension_numbers = #tpu.dot_dimension_numbers<[1], [0], [0], [1], [0, 0, 1, 1], [], []>} : vector<16x64xbf16>, vector<64x64xbf16>, vector<16x64xf32> -> vector<16x64xf32>
    %63 = arith.addf %54, %62 : vector<16x64xf32>
    %64 = vector.extract_strided_slice %8 {offsets = [48, 0], sizes = [16, 64], strides = [1, 1]} : vector<64x64xbf16> to vector<16x64xbf16>
    %c6 = arith.constant 6 : index
    %c0_50 = arith.constant 0 : index
    %c0_51 = arith.constant 0 : index
    %65 = vector.load %arg3[%c6, %c0_50, %c0_51] : memref<9x16x16xbf16, #tpu.memory_space<vmem>>, vector<1x16x16xbf16>
    %66 = vector.shape_cast %65 : vector<1x16x16xbf16> to vector<16x16xbf16>
    %cst_52 = arith.constant dense<0.000000e+00> : vector<16x64xf32>
    %67 = tpu.matmul %66, %64, %cst_52 {dimension_numbers = #tpu.dot_dimension_numbers<[1], [0], [0], [1], [0, 0, 1, 1], [], []>} : vector<16x16xbf16>, vector<16x64xbf16>, vector<16x64xf32> -> vector<16x64xf32>
    %68 = arith.truncf %67 : vector<16x64xf32> to vector<16x64xbf16>
    %c6_53 = arith.constant 6 : index
    %c0_54 = arith.constant 0 : index
    %c0_55 = arith.constant 0 : index
    %69 = vector.load %arg4[%c6_53, %c0_54, %c0_55] : memref<9x64x64xbf16, #tpu.memory_space<vmem>>, vector<1x64x64xbf16>
    %70 = vector.shape_cast %69 : vector<1x64x64xbf16> to vector<64x64xbf16>
    %cst_56 = arith.constant dense<0.000000e+00> : vector<16x64xf32>
    %71 = tpu.matmul %68, %70, %cst_56 {dimension_numbers = #tpu.dot_dimension_numbers<[1], [0], [0], [1], [0, 0, 1, 1], [], []>} : vector<16x64xbf16>, vector<64x64xbf16>, vector<16x64xf32> -> vector<16x64xf32>
    %72 = arith.addf %63, %71 : vector<16x64xf32>
    %73 = vector.extract_strided_slice %8 {offsets = [32, 0], sizes = [16, 64], strides = [1, 1]} : vector<64x64xbf16> to vector<16x64xbf16>
    %c7 = arith.constant 7 : index
    %c0_57 = arith.constant 0 : index
    %c0_58 = arith.constant 0 : index
    %74 = vector.load %arg3[%c7, %c0_57, %c0_58] : memref<9x16x16xbf16, #tpu.memory_space<vmem>>, vector<1x16x16xbf16>
    %75 = vector.shape_cast %74 : vector<1x16x16xbf16> to vector<16x16xbf16>
    %cst_59 = arith.constant dense<0.000000e+00> : vector<16x64xf32>
    %76 = tpu.matmul %75, %73, %cst_59 {dimension_numbers = #tpu.dot_dimension_numbers<[1], [0], [0], [1], [0, 0, 1, 1], [], []>} : vector<16x16xbf16>, vector<16x64xbf16>, vector<16x64xf32> -> vector<16x64xf32>
    %77 = arith.truncf %76 : vector<16x64xf32> to vector<16x64xbf16>
    %c7_60 = arith.constant 7 : index
    %c0_61 = arith.constant 0 : index
    %c0_62 = arith.constant 0 : index
    %78 = vector.load %arg4[%c7_60, %c0_61, %c0_62] : memref<9x64x64xbf16, #tpu.memory_space<vmem>>, vector<1x64x64xbf16>
    %79 = vector.shape_cast %78 : vector<1x64x64xbf16> to vector<64x64xbf16>
    %cst_63 = arith.constant dense<0.000000e+00> : vector<16x64xf32>
    %80 = tpu.matmul %77, %79, %cst_63 {dimension_numbers = #tpu.dot_dimension_numbers<[1], [0], [0], [1], [0, 0, 1, 1], [], []>} : vector<16x64xbf16>, vector<64x64xbf16>, vector<16x64xf32> -> vector<16x64xf32>
    %81 = arith.addf %72, %80 : vector<16x64xf32>
    %82 = vector.extract_strided_slice %8 {offsets = [48, 0], sizes = [16, 64], strides = [1, 1]} : vector<64x64xbf16> to vector<16x64xbf16>
    %c8 = arith.constant 8 : index
    %c0_64 = arith.constant 0 : index
    %c0_65 = arith.constant 0 : index
    %83 = vector.load %arg3[%c8, %c0_64, %c0_65] : memref<9x16x16xbf16, #tpu.memory_space<vmem>>, vector<1x16x16xbf16>
    %84 = vector.shape_cast %83 : vector<1x16x16xbf16> to vector<16x16xbf16>
    %cst_66 = arith.constant dense<0.000000e+00> : vector<16x64xf32>
    %85 = tpu.matmul %84, %82, %cst_66 {dimension_numbers = #tpu.dot_dimension_numbers<[1], [0], [0], [1], [0, 0, 1, 1], [], []>} : vector<16x16xbf16>, vector<16x64xbf16>, vector<16x64xf32> -> vector<16x64xf32>
    %86 = arith.truncf %85 : vector<16x64xf32> to vector<16x64xbf16>
    %c8_67 = arith.constant 8 : index
    %c0_68 = arith.constant 0 : index
    %c0_69 = arith.constant 0 : index
    %87 = vector.load %arg4[%c8_67, %c0_68, %c0_69] : memref<9x64x64xbf16, #tpu.memory_space<vmem>>, vector<1x64x64xbf16>
    %88 = vector.shape_cast %87 : vector<1x64x64xbf16> to vector<64x64xbf16>
    %cst_70 = arith.constant dense<0.000000e+00> : vector<16x64xf32>
    %89 = tpu.matmul %86, %88, %cst_70 {dimension_numbers = #tpu.dot_dimension_numbers<[1], [0], [0], [1], [0, 0, 1, 1], [], []>} : vector<16x64xbf16>, vector<64x64xbf16>, vector<16x64xf32> -> vector<16x64xf32>
    %90 = arith.addf %81, %89 : vector<16x64xf32>
    %c0_71 = arith.constant 0 : index
    %c0_72 = arith.constant 0 : index
    %91 = vector.load %arg5[%c0_71, %c0_72] : memref<1x64xf32, #tpu.memory_space<vmem>>, vector<1x64xf32>
    %92 = vector.broadcast %91 : vector<1x64xf32> to vector<16x64xf32>
    %93 = arith.addf %90, %92 : vector<16x64xf32>
    %cst_73 = arith.constant 0.000000e+00 : f32
    %94 = vector.broadcast %cst_73 : f32 to vector<16x64xf32>
    %95 = arith.maximumf %93, %94 : vector<16x64xf32>
    %96 = arith.truncf %95 : vector<16x64xf32> to vector<16x64xbf16>
    %c0_74 = arith.constant 0 : index
    %c0_75 = arith.constant 0 : index
    %97 = vector.load %arg0[%c0_74, %c0_75] : memref<64x16xbf16, #tpu.memory_space<vmem>>, vector<16x16xbf16>
    %c0_76 = arith.constant 0 : index
    %c0_77 = arith.constant 0 : index
    %98 = vector.load %arg6[%c0_76, %c0_77] : memref<64x256xbf16, #tpu.memory_space<vmem>>, vector<64x256xbf16>
    %cst_78 = arith.constant dense<0.000000e+00> : vector<16x256xf32>
    %99 = tpu.matmul %96, %98, %cst_78 {dimension_numbers = #tpu.dot_dimension_numbers<[1], [0], [0], [1], [0, 0, 1, 1], [], []>} : vector<16x64xbf16>, vector<64x256xbf16>, vector<16x256xf32> -> vector<16x256xf32>
    %c0_79 = arith.constant 0 : index
    %c0_80 = arith.constant 0 : index
    %100 = vector.load %arg7[%c0_79, %c0_80] : memref<16x256xbf16, #tpu.memory_space<vmem>>, vector<16x256xbf16>
    %cst_81 = arith.constant dense<0.000000e+00> : vector<16x256xf32>
    %101 = tpu.matmul %97, %100, %cst_81 {dimension_numbers = #tpu.dot_dimension_numbers<[1], [0], [0], [1], [0, 0, 1, 1], [], []>} : vector<16x16xbf16>, vector<16x256xbf16>, vector<16x256xf32> -> vector<16x256xf32>
    %102 = arith.addf %99, %101 : vector<16x256xf32>
    %c0_82 = arith.constant 0 : index
    %c0_83 = arith.constant 0 : index
    %103 = vector.load %arg8[%c0_82, %c0_83] : memref<1x256xf32, #tpu.memory_space<vmem>>, vector<1x256xf32>
    %104 = vector.broadcast %103 : vector<1x256xf32> to vector<16x256xf32>
    %105 = arith.addf %102, %104 : vector<16x256xf32>
    %cst_84 = arith.constant 0.000000e+00 : f32
    %106 = vector.broadcast %cst_84 : f32 to vector<16x256xf32>
    %107 = arith.maximumf %105, %106 : vector<16x256xf32>
    %cst_85 = arith.constant 0.000000e+00 : f32
    %108 = vector.broadcast %cst_85 : f32 to vector<4x256xf32>
    %109 = vector.extract_strided_slice %107 {offsets = [0, 0], sizes = [1, 256], strides = [1, 1]} : vector<16x256xf32> to vector<1x256xf32>
    %110 = vector.extract_strided_slice %107 {offsets = [0, 0], sizes = [4, 256], strides = [1, 1]} : vector<16x256xf32> to vector<4x256xf32>
    %111 = vector.broadcast %109 : vector<1x256xf32> to vector<4x256xf32>
    %112 = arith.mulf %111, %110 : vector<4x256xf32>
    %113 = arith.addf %108, %112 : vector<4x256xf32>
    %114 = vector.extract_strided_slice %107 {offsets = [1, 0], sizes = [1, 256], strides = [1, 1]} : vector<16x256xf32> to vector<1x256xf32>
    %115 = vector.extract_strided_slice %107 {offsets = [4, 0], sizes = [4, 256], strides = [1, 1]} : vector<16x256xf32> to vector<4x256xf32>
    %116 = vector.broadcast %114 : vector<1x256xf32> to vector<4x256xf32>
    %117 = arith.mulf %116, %115 : vector<4x256xf32>
    %118 = arith.addf %113, %117 : vector<4x256xf32>
    %119 = vector.extract_strided_slice %107 {offsets = [2, 0], sizes = [1, 256], strides = [1, 1]} : vector<16x256xf32> to vector<1x256xf32>
    %120 = vector.extract_strided_slice %107 {offsets = [8, 0], sizes = [4, 256], strides = [1, 1]} : vector<16x256xf32> to vector<4x256xf32>
    %121 = vector.broadcast %119 : vector<1x256xf32> to vector<4x256xf32>
    %122 = arith.mulf %121, %120 : vector<4x256xf32>
    %123 = arith.addf %118, %122 : vector<4x256xf32>
    %124 = vector.extract_strided_slice %107 {offsets = [3, 0], sizes = [1, 256], strides = [1, 1]} : vector<16x256xf32> to vector<1x256xf32>
    %125 = vector.extract_strided_slice %107 {offsets = [12, 0], sizes = [4, 256], strides = [1, 1]} : vector<16x256xf32> to vector<4x256xf32>
    %126 = vector.broadcast %124 : vector<1x256xf32> to vector<4x256xf32>
    %127 = arith.mulf %126, %125 : vector<4x256xf32>
    %128 = arith.addf %123, %127 : vector<4x256xf32>
    %cst_86 = arith.constant 0.000000e+00 : f32
    %129 = vector.broadcast %cst_86 : f32 to vector<4x256xf32>
    %130 = vector.extract_strided_slice %107 {offsets = [4, 0], sizes = [1, 256], strides = [1, 1]} : vector<16x256xf32> to vector<1x256xf32>
    %131 = vector.extract_strided_slice %107 {offsets = [0, 0], sizes = [4, 256], strides = [1, 1]} : vector<16x256xf32> to vector<4x256xf32>
    %132 = vector.broadcast %130 : vector<1x256xf32> to vector<4x256xf32>
    %133 = arith.mulf %132, %131 : vector<4x256xf32>
    %134 = arith.addf %129, %133 : vector<4x256xf32>
    %135 = vector.extract_strided_slice %107 {offsets = [5, 0], sizes = [1, 256], strides = [1, 1]} : vector<16x256xf32> to vector<1x256xf32>
    %136 = vector.extract_strided_slice %107 {offsets = [4, 0], sizes = [4, 256], strides = [1, 1]} : vector<16x256xf32> to vector<4x256xf32>
    %137 = vector.broadcast %135 : vector<1x256xf32> to vector<4x256xf32>
    %138 = arith.mulf %137, %136 : vector<4x256xf32>
    %139 = arith.addf %134, %138 : vector<4x256xf32>
    %140 = vector.extract_strided_slice %107 {offsets = [6, 0], sizes = [1, 256], strides = [1, 1]} : vector<16x256xf32> to vector<1x256xf32>
    %141 = vector.extract_strided_slice %107 {offsets = [8, 0], sizes = [4, 256], strides = [1, 1]} : vector<16x256xf32> to vector<4x256xf32>
    %142 = vector.broadcast %140 : vector<1x256xf32> to vector<4x256xf32>
    %143 = arith.mulf %142, %141 : vector<4x256xf32>
    %144 = arith.addf %139, %143 : vector<4x256xf32>
    %145 = vector.extract_strided_slice %107 {offsets = [7, 0], sizes = [1, 256], strides = [1, 1]} : vector<16x256xf32> to vector<1x256xf32>
    %146 = vector.extract_strided_slice %107 {offsets = [12, 0], sizes = [4, 256], strides = [1, 1]} : vector<16x256xf32> to vector<4x256xf32>
    %147 = vector.broadcast %145 : vector<1x256xf32> to vector<4x256xf32>
    %148 = arith.mulf %147, %146 : vector<4x256xf32>
    %149 = arith.addf %144, %148 : vector<4x256xf32>
    %cst_87 = arith.constant 0.000000e+00 : f32
    %150 = vector.broadcast %cst_87 : f32 to vector<4x256xf32>
    %151 = vector.extract_strided_slice %107 {offsets = [8, 0], sizes = [1, 256], strides = [1, 1]} : vector<16x256xf32> to vector<1x256xf32>
    %152 = vector.extract_strided_slice %107 {offsets = [0, 0], sizes = [4, 256], strides = [1, 1]} : vector<16x256xf32> to vector<4x256xf32>
    %153 = vector.broadcast %151 : vector<1x256xf32> to vector<4x256xf32>
    %154 = arith.mulf %153, %152 : vector<4x256xf32>
    %155 = arith.addf %150, %154 : vector<4x256xf32>
    %156 = vector.extract_strided_slice %107 {offsets = [9, 0], sizes = [1, 256], strides = [1, 1]} : vector<16x256xf32> to vector<1x256xf32>
    %157 = vector.extract_strided_slice %107 {offsets = [4, 0], sizes = [4, 256], strides = [1, 1]} : vector<16x256xf32> to vector<4x256xf32>
    %158 = vector.broadcast %156 : vector<1x256xf32> to vector<4x256xf32>
    %159 = arith.mulf %158, %157 : vector<4x256xf32>
    %160 = arith.addf %155, %159 : vector<4x256xf32>
    %161 = vector.extract_strided_slice %107 {offsets = [10, 0], sizes = [1, 256], strides = [1, 1]} : vector<16x256xf32> to vector<1x256xf32>
    %162 = vector.extract_strided_slice %107 {offsets = [8, 0], sizes = [4, 256], strides = [1, 1]} : vector<16x256xf32> to vector<4x256xf32>
    %163 = vector.broadcast %161 : vector<1x256xf32> to vector<4x256xf32>
    %164 = arith.mulf %163, %162 : vector<4x256xf32>
    %165 = arith.addf %160, %164 : vector<4x256xf32>
    %166 = vector.extract_strided_slice %107 {offsets = [11, 0], sizes = [1, 256], strides = [1, 1]} : vector<16x256xf32> to vector<1x256xf32>
    %167 = vector.extract_strided_slice %107 {offsets = [12, 0], sizes = [4, 256], strides = [1, 1]} : vector<16x256xf32> to vector<4x256xf32>
    %168 = vector.broadcast %166 : vector<1x256xf32> to vector<4x256xf32>
    %169 = arith.mulf %168, %167 : vector<4x256xf32>
    %170 = arith.addf %165, %169 : vector<4x256xf32>
    %cst_88 = arith.constant 0.000000e+00 : f32
    %171 = vector.broadcast %cst_88 : f32 to vector<4x256xf32>
    %172 = vector.extract_strided_slice %107 {offsets = [12, 0], sizes = [1, 256], strides = [1, 1]} : vector<16x256xf32> to vector<1x256xf32>
    %173 = vector.extract_strided_slice %107 {offsets = [0, 0], sizes = [4, 256], strides = [1, 1]} : vector<16x256xf32> to vector<4x256xf32>
    %174 = vector.broadcast %172 : vector<1x256xf32> to vector<4x256xf32>
    %175 = arith.mulf %174, %173 : vector<4x256xf32>
    %176 = arith.addf %171, %175 : vector<4x256xf32>
    %177 = vector.extract_strided_slice %107 {offsets = [13, 0], sizes = [1, 256], strides = [1, 1]} : vector<16x256xf32> to vector<1x256xf32>
    %178 = vector.extract_strided_slice %107 {offsets = [4, 0], sizes = [4, 256], strides = [1, 1]} : vector<16x256xf32> to vector<4x256xf32>
    %179 = vector.broadcast %177 : vector<1x256xf32> to vector<4x256xf32>
    %180 = arith.mulf %179, %178 : vector<4x256xf32>
    %181 = arith.addf %176, %180 : vector<4x256xf32>
    %182 = vector.extract_strided_slice %107 {offsets = [14, 0], sizes = [1, 256], strides = [1, 1]} : vector<16x256xf32> to vector<1x256xf32>
    %183 = vector.extract_strided_slice %107 {offsets = [8, 0], sizes = [4, 256], strides = [1, 1]} : vector<16x256xf32> to vector<4x256xf32>
    %184 = vector.broadcast %182 : vector<1x256xf32> to vector<4x256xf32>
    %185 = arith.mulf %184, %183 : vector<4x256xf32>
    %186 = arith.addf %181, %185 : vector<4x256xf32>
    %187 = vector.extract_strided_slice %107 {offsets = [15, 0], sizes = [1, 256], strides = [1, 1]} : vector<16x256xf32> to vector<1x256xf32>
    %188 = vector.extract_strided_slice %107 {offsets = [12, 0], sizes = [4, 256], strides = [1, 1]} : vector<16x256xf32> to vector<4x256xf32>
    %189 = vector.broadcast %187 : vector<1x256xf32> to vector<4x256xf32>
    %190 = arith.mulf %189, %188 : vector<4x256xf32>
    %191 = arith.addf %186, %190 : vector<4x256xf32>
    %192 = tpu.concatenate %128, %149, %170, %191 in 0 : vector<4x256xf32>, vector<4x256xf32>, vector<4x256xf32>, vector<4x256xf32> -> vector<16x256xf32>
    %c0_89 = arith.constant 0 : index
    %c0_90 = arith.constant 0 : index
    %193 = vector.load %arg9[%c0_89, %c0_90] : memref<16x256xf32, #tpu.memory_space<vmem>>, vector<16x256xf32>
    tpu.vector_store %arg9[%c0_89, %c0_90], %192 {strides = array<i32>} : memref<16x256xf32, #tpu.memory_space<vmem>>, vector<16x256xf32>,
    return
  }
}

</mosaic_0001>

<bundles_post_ra>
// kernel: _lambda_.1
= control target key start
LH: loop header
LB: loop body
LE: loop exit
PB: predicated region body
PF: predicated region fallthrough
CT: control target
= control target key end

     0   :  { %14 = vsyncpa [#allocation3], 0  ;;  %s2257_s30 = smov [#allocation2]   ;;  %s2628_s0 = inlined_call_operand.vmem [shape: bf16[64,16], index: 0, kind: input, shape index: {}]   ;;  %s2629_s1 = inlined_call_operand.vmem [shape: bf16[16,64], index: 1, kind: input, shape index: {}]   ;;  %s2630_s2 = inlined_call_operand.vmem [shape: f32[1,64], index: 2, kind: input, shape index: {}]   ;;  %s2631_s3 = inlined_call_operand.vmem [shape: bf16[9,16,16], index: 3, kind: input, shape index: {}]   ;;  %s2632_s4 = inlined_call_operand.hbm [shape: bf16[9,64,64], index: 4, kind: input, shape index: {}]   ;;  %s2633_s5 = inlined_call_operand.vmem [shape: f32[1,64], index: 5, kind: input, shape index: {}]   ;;  %s2634_s6 = inlined_call_operand.vmem [shape: bf16[64,256], index: 6, kind: input, shape index: {}]   ;;  %s2635_s7 = inlined_call_operand.vmem [shape: bf16[16,256], index: 7, kind: input, shape index: {}]   ;;  %s2636_s8 = inlined_call_operand.vmem [shape: f32[1,256], index: 8, kind: input, shape index: {}]   ;;  %s2637_s9 = inlined_call_operand.vmem [shape: f32[16,256], index: 9, kind: output, shape index: {}]  }
   0x1   :  { %s28_s10 = sshll.u32 %s2257_s30, 4  ;;  %s29_s10 = int_to_ptr.vmem [resolvable:$true] %s28_s10 }
   0x2   :  { %s2243_s11 = scalar_lea.vmem %s29_s10, 4608  ;;  %p2248_p1 = scmp.lt.s32.totalorder %s29_s10, %s29_s10 }
   0x3   :  { %p2244_p0 = scmp.ne.s32.totalorder %s29_s10, %s2243_s11  ;;  %p2249_p2 = scmp.lt.s32.totalorder %s2243_s11, %s2243_s11 }
   0x5   :  { %p2250_p3 = por %p2249_p2, %p2248_p1 }
   0x7   :  { %p2251_p4 = pnand %p2250_p3, %p2244_p0 }
   0x9   :  { %2254 = shalt.err (!%p2251_p4)
}
   0xa   :  { %s2258_s12 = smov 64   ;;  %s2259_s13 = smov 4  }
   0xb   :  { %34 = dma.hbm_to_vmem [thread:$0]  %s2632_s4, 4608, %s29_s10, [#allocation3], %s2258_s12, %s2258_s12, %s2259_s13  }
   0xc   :  { %2255 = dma.done.wait [#allocation3], 4608  }
   0xd   :  { %2256 = vsyncadd [#allocation3], 4294962688  ;;  %v2169_v0 = vld [vmem:[%s2629_s1] sm:$0xff]   ;;  %vm90_vm0 = vcmask 130048   ;;  %v2171_v2 = vld [vmem:[%s2628_s0 + $0x8] sm:$0xff]   ;;  %v2260_v5 = vmov 0.0  }
   0xe   :  { %v2170_v1 = vld [vmem:[%s2628_s0] sm:$0xff]   ;;  %1991 = vmatprep.subr.bf16.mxu0 %v2169_v0  ;;  %v2172_v3 = vld [vmem:[%s2628_s0 + $0x10] sm:$0xff]   ;;  %v2173_v4 = vld [vmem:[%s2628_s0 + $0x18] sm:$0xff]   ;;  %2001 = vmatprep.subr.bf16.mxu1 %v2260_v5  ;;  %vm2261_vm1 = vmmov 0   ;;  %vm326_vm2 = vcmask 523264   ;;  %vm1806_vm3 = vcmask 1043456  }
   0xf   :  { %1992 = vmatpush3.bf16.msra.mxu0 %v2169_v0  ;;  %1993 = vmatprep.mubr.msk.bf16.mxu0 %vm90_vm0, %v2170_v1  ;;  %v2178_v6 = vld [vmem:[#allocation2 + $0x38] sm:$0xff]   ;;  %v1820_v7 = vld [vmem:[%s2630_s2] ss:$0 sm:$0xff]  ;;  %v2175_v37 = vld [vmem:[%s2631_s3 + $0x8] sm:$0xff]  }
  0x10   :  { %2013 = vmatprep.subr.bf16.mxu0 %v2260_v5  ;;  %2003 = vmatprep.mubr.msk.bf16.mxu1 %vm2261_vm1, %v2260_v5  ;;  %v2174_v34 = vld [vmem:[%s2631_s3] sm:$0xff]   ;;  %v2176_v38 = vld [vmem:[#allocation2 + $0x18] sm:$0xff]   ;;  %v2177_v39 = vld [vmem:[#allocation2 + $0x10] sm:$0xff]  }
  0x11   :  { %v2179_v40 = vld [vmem:[#allocation2 + $0x8] sm:$0xff]   ;;  %v2180_v41 = vld [vmem:[#allocation2 + $0x30] sm:$0xff]   ;;  %v2181_v42 = vld [vmem:[#allocation2] sm:$0xff]  }
  0x12   :  { %1994 = vmatmul.mubr.msk.bf16.vlgmr.msra.gmra.mxu0 %vm90_vm0, %v2171_v2  ;;  %v2182_v43 = vld [vmem:[#allocation2 + $0x28] sm:$0xff]   ;;  %v2183_v44 = vld [vmem:[#allocation2 + $0x20] sm:$0xff]   ;;  %v2184_v52 = vld [vmem:[%s2631_s3 + $0x18] sm:$0xff]  }
  0x13   :  { %1997 = vmatprep.mubr.msk.bf16.mxu0 %vm90_vm0, %v2172_v3  ;;  %2014 = vmatpush3.bf16.msra.mxu0 %v2178_v6  ;;  %v2186_v55 = vld [vmem:[#allocation2 + $0x78] sm:$0xff]   ;;  %v2185_v57 = vld [vmem:[%s2631_s3 + $0x10] sm:$0xff]   ;;  %v2189_v60 = vld [vmem:[#allocation2 + $0x68] sm:$0xff]  }
  0x14   :  { %2015 = vmatprep.subr.bf16.mxu0 %v2260_v5  ;;  %v2187_v58 = vld [vmem:[#allocation2 + $0x70] sm:$0xff]   ;;  %v2188_v59 = vld [vmem:[#allocation2 + $0x58] sm:$0xff]   ;;  %v2191_v62 = vld [vmem:[#allocation2 + $0x60] sm:$0xff]  }
  0x15   :  { %v2190_v61 = vld [vmem:[#allocation2 + $0x50] sm:$0xff]   ;;  %v2192_v63 = vld [vmem:[#allocation2 + $0x48] sm:$0xff]   ;;  %v2193_v0 = vld [vmem:[#allocation2 + $0x40] sm:$0xff]  }
  0x17   :  { %2016 = vmatpush3.bf16.msra.mxu0 %v2180_v41 }
  0x18   :  { %2017 = vmatprep.subr.bf16.mxu0 %v2260_v5 }
  0x1a   :  { %1998 = vmatmul.mubr.msk.bf16.gmra.mxu0 %vm90_vm0, %v2173_v4 }
  0x1b   :  { %2021 = vmatprep.mubr.msk.bf16.mxu0 %vm2261_vm1, %v2260_v5  ;;  %2018 = vmatpush3.bf16.msra.mxu0 %v2182_v43 }
  0x1c   :  { %2019 = vmatprep.subr.bf16.mxu0 %v2260_v5 }
  0x1f   :  { %2020 = vmatpush3.bf16.msra.mxu0 %v2183_v44 }
  0x20   :  { %2037 = vmatprep.subr.bf16.mxu0 %v2260_v5 }
  0xd2   :  { %v1995_v8 = vpop.f32.mrf.mxu0 }
  0xd3   :  { %v146_v9 = vadd.f32 %v1995_v8, %v1820_v7 }
  0xd4   :  { %v137_v10 = vpop.f32.mrf.mxu0 }
  0xd5   :  { %v138_v11 = vadd.f32 %v1820_v7, %v137_v10  ;;  %v170_v15 = vmax.f32 %v146_v9, 0.0 }
  0xd6   :  { %v1996_v12 = vpop.f32.mrf.mxu0 }
  0xd7   :  { %v149_v13 = vadd.f32 %v1996_v12, %v1820_v7  ;;  %v168_v19 = vmax.f32 %v138_v11, 0.0 }
  0xd8   :  { %v140_v14 = vpop.f32.mrf.mxu0 }
  0xd9   :  { %v171_v16 = vmax.f32 %v149_v13, 0.0  ;;  %v141_v17 = vadd.f32 %v1820_v7, %v140_v14 }
  0xda   :  { %v1999_v18 = vpop.f32.mrf.mxu0 }
  0xdb   :  { %v2345_v20 = vpack.c.bf16 %v171_v16, %v170_v15  ;;  %v169_v21 = vmax.f32 %v141_v17, 0.0  ;;  %v162_v24 = vadd.f32 %v1999_v18, %v1820_v7 }
  0xdc   :  { %v153_v22 = vpop.f32.mrf.mxu0 }
  0xdd   :  { %v2347_v23 = vpack.c.bf16 %v169_v21, %v168_v19  ;;  %v174_v28 = vmax.f32 %v162_v24, 0.0  ;;  %v154_v29 = vadd.f32 %v1820_v7, %v153_v22  ;;  %v2194_v19 = vld [vmem:[%s2631_s3 + $0x28] sm:$0xff]   ;;  %v2196_v24 = vld [vmem:[#allocation2 + $0xb8] sm:$0xff]  }
  0xde   :  { %v2000_v25 = vpop.f32.mrf.mxu0 }
  0xdf   :  { %v165_v26 = vadd.f32 %v2000_v25, %v1820_v7  ;;  %v172_v35 = vmax.f32 %v154_v29, 0.0  ;;  %v2201_v29 = vld [vmem:[#allocation2 + $0xa0] sm:$0xff]  }
  0xe0   :  { %v156_v27 = vpop.f32.mrf.mxu0 }
  0xe1   :  { %v175_v30 = vmax.f32 %v165_v26, 0.0  ;;  %v157_v31 = vadd.f32 %v1820_v7, %v156_v27  ;;  %v2198_v26 = vld [vmem:[#allocation2 + $0x98] sm:$0xff]   ;;  %v2199_v27 = vld [vmem:[#allocation2 + $0xa8] sm:$0xff]  }
  0xe3   :  { %v2349_v32 = vpack.c.bf16 %v175_v30, %v174_v28  ;;  %v173_v33 = vmax.f32 %v157_v31, 0.0  ;;  %v2200_v28 = vld [vmem:[#allocation2 + $0x90] sm:$0xff]   ;;  %v2202_v30 = vld [vmem:[#allocation2 + $0x88] sm:$0xff]   ;;  %v2203_v31 = vld [vmem:[#allocation2 + $0x80] sm:$0xff]  }
  0xe5   :  { %2002 = vmatpush3.bf16.msra.mxu1 %v2349_v32  ;;  %v2356_v36 = vpack.c.bf16 %v173_v33, %v172_v35 }
  0xe6   :  { %2007 = vmatprep.subr.bf16.mxu1 %v2260_v5 }
  0xe8   :  { %2004 = vmatmul.mubr.msk.bf16.vlgmr.msra.gmra.mxu1 %vm90_vm0, %v2174_v34 }
  0xe9   :  { %2008 = vmatpush3.bf16.msra.mxu1 %v2356_v36  ;;  %2009 = vmatprep.mubr.msk.bf16.mxu1 %vm2261_vm1, %v2260_v5 }
  0xea   :  { %2025 = vmatprep.subr.bf16.mxu1 %v2260_v5 }
  0xf0   :  { %2010 = vmatmul.mubr.msk.bf16.vlgmr.msra.gmra.mxu1 %vm90_vm0, %v2175_v37 }
  0xf1   :  { %2026 = vmatpush3.bf16.msra.mxu1 %v2176_v38  ;;  %2033 = vmatprep.mubr.msk.bf16.mxu1 %vm2261_vm1, %v2260_v5 }
  0xf2   :  { %2027 = vmatprep.subr.bf16.mxu1 %v2260_v5 }
  0xf5   :  { %2028 = vmatpush3.bf16.msra.mxu1 %v2177_v39 }
  0xf6   :  { %2029 = vmatprep.subr.bf16.mxu1 %v2260_v5 }
  0xf9   :  { %2030 = vmatpush3.bf16.msra.mxu1 %v2179_v40 }
  0xfa   :  { %2031 = vmatprep.subr.bf16.mxu1 %v2260_v5 }
  0xfd   :  { %2032 = vmatpush3.bf16.msra.mxu1 %v2181_v42 }
  0xfe   :  { %2055 = vmatprep.subr.bf16.mxu1 %v2260_v5 }
 0x1a8   :  { %v224_v45 = vpop.f32.mrf.mxu1 }
 0x1aa   :  { %v2005_v46 = vpop.f32.mrf.mxu1 }
 0x1ac   :  { %v227_v47 = vpop.f32.mrf.mxu1 }
 0x1ad   :  { %v231_v48 = vpack.c.bf16 %v227_v47, %v224_v45 }
 0x1ae   :  { %v2006_v49 = vpop.f32.mrf.mxu1 }
 0x1af   :  { %2034 = vmatmul.mubr.msk.bf16.vlgmr.msra.gmra.mxu1 %vm326_vm2, %v231_v48 }
 0x1b0   :  { %2056 = vmatpush3.bf16.msra.mxu1 %v2345_v20  ;;  %v285_v50 = vpop.f32.mrf.mxu1  ;;  %2057 = vmatprep.mubr.msk.bf16.mxu1 %vm2261_vm1, %v2260_v5 }
 0x1b1   :  { %2061 = vmatprep.subr.bf16.mxu1 %v2260_v5 }
 0x1b2   :  { %v2011_v51 = vpop.f32.mrf.mxu1 }
 0x1b4   :  { %v288_v53 = vpop.f32.mrf.mxu1 }
 0x1b5   :  { %v292_v54 = vpack.c.bf16 %v288_v53, %v285_v50  ;;  %v2205_v53 = vld [vmem:[%s2631_s3 + $0x38] sm:$0xff]  }
 0x1b6   :  { %v2012_v56 = vpop.f32.mrf.mxu1 }
 0x1b7   :  { %2022 = vmatmul.mubr.msk.bf16.vlgmr.msra.gmra.mxu0 %vm326_vm2, %v292_v54  ;;  %2058 = vmatmul.mubr.msk.bf16.vlgmr.msra.gmra.mxu1 %vm90_vm0, %v2184_v52 }
 0x1b8   :  { %2038 = vmatpush3.bf16.msra.mxu0 %v2349_v32  ;;  %2039 = vmatprep.mubr.msk.bf16.mxu0 %vm2261_vm1, %v2260_v5 }
 0x1b9   :  { %2062 = vmatpush3.bf16.msra.mxu1 %v2186_v55  ;;  %2043 = vmatprep.subr.bf16.mxu0 %v2260_v5 }
 0x1ba   :  { %2063 = vmatprep.subr.bf16.mxu1 %v2260_v5  ;;  %2069 = vmatprep.mubr.msk.bf16.mxu1 %vm2261_vm1, %v2260_v5 }
 0x1bd   :  { %2064 = vmatpush3.bf16.msra.mxu1 %v2187_v58  ;;  %v2207_v58 = vld [vmem:[#allocation2 + $0xf8] sm:$0xff]  }
 0x1be   :  { %2065 = vmatprep.subr.bf16.mxu1 %v2260_v5 }
 0x1bf   :  { %2040 = vmatmul.mubr.msk.bf16.vlgmr.msra.gmra.mxu0 %vm90_vm0, %v2185_v57  ;;  %v2206_v57 = vld [vmem:[#allocation2 + $0xd8] sm:$0xff]  }
 0x1c0   :  { %2051 = vmatprep.mubr.msk.bf16.mxu0 %vm2261_vm1, %v2260_v5  ;;  %2044 = vmatpush3.bf16.msra.mxu0 %v2188_v59  ;;  %v2208_v59 = vld [vmem:[#allocation2 + $0xd0] sm:$0xff]  }
 0x1c1   :  { %2066 = vmatpush3.bf16.msra.mxu1 %v2189_v60  ;;  %2045 = vmatprep.subr.bf16.mxu0 %v2260_v5  ;;  %v2209_v60 = vld [vmem:[#allocation2 + $0xf0] sm:$0xff]  }
 0x1c2   :  { %2067 = vmatprep.subr.bf16.mxu1 %v2260_v5 }
 0x1c4   :  { %2046 = vmatpush3.bf16.msra.mxu0 %v2190_v61  ;;  %v2210_v61 = vld [vmem:[#allocation2 + $0xc8] sm:$0xff]  }
 0x1c5   :  { %2068 = vmatpush3.bf16.msra.mxu1 %v2191_v62  ;;  %2047 = vmatprep.subr.bf16.mxu0 %v2260_v5  ;;  %v2211_v62 = vld [vmem:[#allocation2 + $0xe8] sm:$0xff]  }
 0x1c6   :  { %2091 = vmatprep.subr.bf16.mxu1 %v2260_v5 }
 0x1c8   :  { %2048 = vmatpush3.bf16.msra.mxu0 %v2192_v63  ;;  %v2212_v63 = vld [vmem:[#allocation2 + $0xc0] sm:$0xff]  }
 0x1c9   :  { %2049 = vmatprep.subr.bf16.mxu0 %v2260_v5 }
 0x1cc   :  { %2050 = vmatpush3.bf16.msra.mxu0 %v2193_v0  ;;  %v2213_v0 = vld [vmem:[#allocation2 + $0xe0] sm:$0xff]  }
 0x1cd   :  { %2073 = vmatprep.subr.bf16.mxu0 %v2260_v5 }
 0x26f   :  { %v432_v1 = vpop.f32.mrf.mxu1 }
 0x271   :  { %v2035_v2 = vpop.f32.mrf.mxu1 }
 0x273   :  { %v435_v3 = vpop.f32.mrf.mxu1 }
 0x275   :  { %v2036_v4 = vpop.f32.mrf.mxu1 }
 0x277   :  { %v364_v6 = vpop.f32.mrf.mxu0  ;;  %v616_v7 = vpop.f32.mrf.mxu1 }
 0x278   :  { %v433_v8 = vadd.f32 %v432_v1, %v364_v6 }
 0x279   :  { %v2023_v9 = vpop.f32.mrf.mxu0  ;;  %v2059_v10 = vpop.f32.mrf.mxu1 }
 0x27b   :  { %v367_v11 = vpop.f32.mrf.mxu0  ;;  %v619_v12 = vpop.f32.mrf.mxu1 }
 0x27c   :  { %v436_v13 = vadd.f32 %v435_v3, %v367_v11  ;;  %v623_v14 = vpack.c.bf16 %v619_v12, %v616_v7 }
 0x27d   :  { %v2024_v15 = vpop.f32.mrf.mxu0  ;;  %v2060_v16 = vpop.f32.mrf.mxu1 }
 0x27e   :  { %2070 = vmatmul.mubr.msk.bf16.vlgmr.msra.gmra.mxu1 %vm326_vm2, %v623_v14 }
 0x27f   :  { %2092 = vmatpush3.bf16.msra.mxu1 %v2345_v20  ;;  %v484_v17 = vpop.f32.mrf.mxu0  ;;  %2093 = vmatprep.mubr.msk.bf16.mxu1 %vm2261_vm1, %v2260_v5  ;;  %v2195_v20 = vld [vmem:[%s2631_s3 + $0x20] sm:$0xff]  }
 0x280   :  { %2097 = vmatprep.subr.bf16.mxu1 %v2260_v5 }
 0x281   :  { %v2041_v18 = vpop.f32.mrf.mxu0 }
 0x283   :  { %v487_v21 = vpop.f32.mrf.mxu0 }
 0x284   :  { %v491_v22 = vpack.c.bf16 %v487_v21, %v484_v17 }
 0x285   :  { %v2042_v25 = vpop.f32.mrf.mxu0 }
 0x286   :  { %2052 = vmatmul.mubr.msk.bf16.vlgmr.msra.gmra.mxu0 %vm326_vm2, %v491_v22  ;;  %2094 = vmatmul.mubr.msk.bf16.vlgmr.msra.gmra.mxu1 %vm90_vm0, %v2194_v19 }
 0x287   :  { %2074 = vmatpush3.bf16.msra.mxu0 %v2347_v23  ;;  %2075 = vmatprep.mubr.msk.bf16.mxu0 %vm2261_vm1, %v2260_v5  ;;  %v2197_v23 = vld [vmem:[#allocation2 + $0xb0] sm:$0xff]  }
 0x288   :  { %2098 = vmatpush3.bf16.msra.mxu1 %v2196_v24  ;;  %2079 = vmatprep.subr.bf16.mxu0 %v2260_v5 }
 0x289   :  { %2099 = vmatprep.subr.bf16.mxu1 %v2260_v5  ;;  %2105 = vmatprep.mubr.msk.bf16.mxu1 %vm2261_vm1, %v2260_v5 }
 0x28c   :  { %2100 = vmatpush3.bf16.msra.mxu1 %v2197_v23  ;;  %v2215_v23 = vld [vmem:[#allocation2 + $0x118] sm:$0xff]  }
 0x28d   :  { %2101 = vmatprep.subr.bf16.mxu1 %v2260_v5 }
 0x28e   :  { %2076 = vmatmul.mubr.msk.bf16.vlgmr.msra.gmra.mxu0 %vm90_vm0, %v2195_v20  ;;  %v2214_v20 = vld [vmem:[%s2631_s3 + $0x40] sm:$0xff]  }
 0x28f   :  { %2087 = vmatprep.mubr.msk.bf16.mxu0 %vm2261_vm1, %v2260_v5  ;;  %2080 = vmatpush3.bf16.msra.mxu0 %v2198_v26  ;;  %v2216_v26 = vld [vmem:[#allocation2 + $0x110] sm:$0xff]  }
 0x290   :  { %2102 = vmatpush3.bf16.msra.mxu1 %v2199_v27  ;;  %2081 = vmatprep.subr.bf16.mxu0 %v2260_v5  ;;  %v2218_v27 = vld [vmem:[#allocation2 + $0x100] sm:$0xff]  }
 0x291   :  { %2103 = vmatprep.subr.bf16.mxu1 %v2260_v5 }
 0x293   :  { %2082 = vmatpush3.bf16.msra.mxu0 %v2200_v28  ;;  %v2219_v28 = vld [vmem:[%s2635_s7] ss:$8 sps:$4 sm:$0xff]  }
 0x294   :  { %2104 = vmatpush3.bf16.msra.mxu1 %v2201_v29  ;;  %2083 = vmatprep.subr.bf16.mxu0 %v2260_v5  ;;  %v2221_v29 = vld [vmem:[%s2635_s7 + $0x4] ss:$8 sps:$4 sm:$0xff]  }
 0x295   :  { %2127 = vmatprep.subr.bf16.mxu1 %v2260_v5 }
 0x297   :  { %2084 = vmatpush3.bf16.msra.mxu0 %v2202_v30  ;;  %v2262_v30 = vmov 0  }
 0x298   :  { %2085 = vmatprep.subr.bf16.mxu0 %v2260_v5 }
 0x29b   :  { %2086 = vmatpush3.bf16.msra.mxu0 %v2203_v31  ;;  %v2225_v31 = vld [vmem:[%s2634_s6 + $0x34] ss:$8 sps:$4 sm:$0xff]  }
 0x29c   :  { %2109 = vmatprep.subr.bf16.mxu0 %v2260_v5 }
 0x33e   :  { %v694_v33 = vpop.f32.mrf.mxu1 }
 0x340   :  { %v2071_v34 = vpop.f32.mrf.mxu1 }
 0x342   :  { %v697_v35 = vpop.f32.mrf.mxu1 }
 0x344   :  { %v2072_v37 = vpop.f32.mrf.mxu1 }
 0x346   :  { %v562_v38 = vpop.f32.mrf.mxu0  ;;  %v880_v39 = vpop.f32.mrf.mxu1 }
 0x347   :  { %v569_v40 = vadd.f32 %v562_v38, %v433_v8 }
 0x348   :  { %v2053_v41 = vpop.f32.mrf.mxu0  ;;  %v2095_v42 = vpop.f32.mrf.mxu1 }
 0x349   :  { %v701_v43 = vadd.f32 %v694_v33, %v569_v40  ;;  %v2223_v33 = vld [vmem:[%s2634_s6 + $0x30] ss:$8 sps:$4 sm:$0xff]  }
 0x34a   :  { %v565_v44 = vpop.f32.mrf.mxu0  ;;  %v883_v45 = vpop.f32.mrf.mxu1 }
 0x34b   :  { %v570_v46 = vadd.f32 %v565_v44, %v436_v13  ;;  %v887_v47 = vpack.c.bf16 %v883_v45, %v880_v39 }
 0x34c   :  { %v2054_v48 = vpop.f32.mrf.mxu0  ;;  %v2096_v49 = vpop.f32.mrf.mxu1 }
 0x34d   :  { %2106 = vmatmul.mubr.msk.bf16.vlgmr.msra.gmra.mxu1 %vm326_vm2, %v887_v47  ;;  %v702_v50 = vadd.f32 %v697_v35, %v570_v46 }
 0x34e   :  { %2128 = vmatpush3.bf16.msra.mxu1 %v2356_v36  ;;  %v748_v51 = vpop.f32.mrf.mxu0  ;;  %2129 = vmatprep.mubr.msk.bf16.mxu1 %vm2261_vm1, %v2260_v5  ;;  %v2204_v36 = vld [vmem:[%s2631_s3 + $0x30] sm:$0xff]  }
 0x34f   :  { %2133 = vmatprep.subr.bf16.mxu1 %v2260_v5 }
 0x350   :  { %v2077_v52 = vpop.f32.mrf.mxu0 }
 0x351   :  { %v2228_v52 = vld [vmem:[%s2634_s6 + $0x24] ss:$8 sps:$4 sm:$0xff]  }
 0x352   :  { %v751_v54 = vpop.f32.mrf.mxu0 }
 0x353   :  { %v755_v55 = vpack.c.bf16 %v751_v54, %v748_v51  ;;  %v2231_v54 = vld [vmem:[%s2634_s6 + $0x14] ss:$8 sps:$4 sm:$0xff]  }
 0x354   :  { %v2078_v56 = vpop.f32.mrf.mxu0 }
 0x355   :  { %2088 = vmatmul.mubr.msk.bf16.vlgmr.msra.gmra.mxu0 %vm326_vm2, %v755_v55  ;;  %2130 = vmatmul.mubr.msk.bf16.vlgmr.msra.gmra.mxu1 %vm90_vm0, %v2205_v53  ;;  %v2226_v53 = vld [vmem:[%s2634_s6 + $0x20] ss:$8 sps:$4 sm:$0xff]   ;;  %v2229_v55 = vld [vmem:[%s2634_s6 + $0x10] ss:$8 sps:$4 sm:$0xff]   ;;  %v2234_v56 = vld [vmem:[%s2634_s6 + $0x4] ss:$8 sps:$4 sm:$0xff]  }
 0x356   :  { %2110 = vmatpush3.bf16.msra.mxu0 %v2349_v32  ;;  %2111 = vmatprep.mubr.msk.bf16.mxu0 %vm2261_vm1, %v2260_v5 }
 0x357   :  { %2115 = vmatprep.subr.bf16.mxu0 %v2260_v5  ;;  %2141 = vmatprep.mubr.msk.bf16.mxu1 %vm2261_vm1, %v2260_v5 }
 0x358   :  { %2134 = vmatpush3.bf16.msra.mxu1 %v2207_v58 }
 0x359   :  { %2135 = vmatprep.subr.bf16.mxu1 %v2260_v5 }
 0x35c   :  { %2136 = vmatpush3.bf16.msra.mxu1 %v2209_v60 }
 0x35d   :  { %2112 = vmatmul.mubr.msk.bf16.vlgmr.msra.gmra.mxu0 %vm90_vm0, %v2204_v36  ;;  %2137 = vmatprep.subr.bf16.mxu1 %v2260_v5  ;;  %v2232_v36 = vld [vmem:[%s2634_s6] ss:$8 sps:$4 sm:$0xff]  }
 0x35e   :  { %2116 = vmatpush3.bf16.msra.mxu0 %v2206_v57  ;;  %2123 = vmatprep.mubr.msk.bf16.mxu0 %vm2261_vm1, %v2260_v5 }
 0x35f   :  { %2117 = vmatprep.subr.bf16.mxu0 %v2260_v5 }
 0x360   :  { %2138 = vmatpush3.bf16.msra.mxu1 %v2211_v62 }
 0x361   :  { %2139 = vmatprep.subr.bf16.mxu1 %v2260_v5 }
 0x362   :  { %2118 = vmatpush3.bf16.msra.mxu0 %v2208_v59  ;;  %v1909_v59 = vld [vmem:[%s2633_s5] ss:$0 sm:$0xff] }
 0x363   :  { %2119 = vmatprep.subr.bf16.mxu0 %v2260_v5 }
 0x364   :  { %2140 = vmatpush3.bf16.msra.mxu1 %v2213_v0 }
 0x365   :  { %1419 = vmatprep.subr.bf16.mxu1 %v2221_v29 }
 0x366   :  { %2120 = vmatpush3.bf16.msra.mxu0 %v2210_v61 }
 0x367   :  { %2121 = vmatprep.subr.bf16.mxu0 %v2260_v5 }
 0x36a   :  { %2122 = vmatpush3.bf16.msra.mxu0 %v2212_v63 }
 0x36b   :  { %2145 = vmatprep.subr.bf16.mxu0 %v2260_v5 }
 0x40d   :  { %v958_v1 = vpop.f32.mrf.mxu1 }
 0x40f   :  { %v2107_v2 = vpop.f32.mrf.mxu1 }
 0x411   :  { %v961_v3 = vpop.f32.mrf.mxu1 }
 0x413   :  { %v2108_v4 = vpop.f32.mrf.mxu1 }
 0x415   :  { %v826_v6 = vpop.f32.mrf.mxu0  ;;  %v1144_v7 = vpop.f32.mrf.mxu1 }
 0x416   :  { %v833_v8 = vadd.f32 %v826_v6, %v701_v43 }
 0x417   :  { %v2089_v9 = vpop.f32.mrf.mxu0  ;;  %v2131_v10 = vpop.f32.mrf.mxu1 }
 0x418   :  { %v965_v11 = vadd.f32 %v958_v1, %v833_v8 }
 0x419   :  { %v829_v12 = vpop.f32.mrf.mxu0  ;;  %v1147_v13 = vpop.f32.mrf.mxu1 }
 0x41a   :  { %v834_v14 = vadd.f32 %v829_v12, %v702_v50  ;;  %v1151_v15 = vpack.c.bf16 %v1147_v13, %v1144_v7  ;;  %v1536_v7 = vlaneseq  ;;  %v1534_v12 = vld [vmem:[%s2636_s8] sm:$0x3] }
 0x41b   :  { %v2090_v16 = vpop.f32.mrf.mxu0  ;;  %v2132_v17 = vpop.f32.mrf.mxu1 }
 0x41c   :  { %v966_v18 = vadd.f32 %v961_v3, %v834_v14  ;;  %2142 = vmatmul.mubr.msk.bf16.vlgmr.msra.gmra.mxu1 %vm326_vm2, %v1151_v15  ;;  %v1537_v9 = vshrl.u32 %v1536_v7, 7 }
 0x41d   :  { %v1012_v19 = vpop.f32.mrf.mxu0  ;;  %1437 = vmatprep.mubr.bf16.mxu1 %v2262_v30  ;;  %1420 = vmatpush1.bf16.msra.mxu1 %v2219_v28 }
 0x41e   :  { %1499 = vmatprep.subr.bf16.mxu1 %v2225_v31  ;;  %v2524_v13 = vsub.s32 1, %v1537_v9  ;;  %v2539_v28 = vsub.s32 3, %v1537_v9  ;;  %v2545_v31 = vsub.s32 6, %v1537_v9 }
 0x41f   :  { %v2113_v21 = vpop.f32.mrf.mxu0 }
 0x421   :  { %v1015_v22 = vpop.f32.mrf.mxu0 }
 0x422   :  { %v1019_v24 = vpack.c.bf16 %v1015_v22, %v1012_v19 }
 0x423   :  { %v2114_v25 = vpop.f32.mrf.mxu0 }
 0x424   :  { %2124 = vmatmul.mubr.msk.bf16.vlgmr.msra.gmra.mxu0 %vm326_vm2, %v1019_v24  ;;  %v2530_v24 = vsub.s32 4, %v1537_v9  ;;  %v2532_v25 = vsub.s32 5, %v1537_v9 }
 0x425   :  { %2146 = vmatpush3.bf16.msra.mxu0 %v2349_v32  ;;  %2147 = vmatprep.mubr.msk.bf16.mxu0 %vm2261_vm1, %v2260_v5  ;;  %v2217_v32 = vld [vmem:[#allocation2 + $0x108] sm:$0xff]  }
 0x426   :  { %2151 = vmatprep.subr.bf16.mxu0 %v2260_v5 }
 0x42c   :  { %2148 = vmatmul.mubr.msk.bf16.vlgmr.msra.gmra.mxu0 %vm90_vm0, %v2214_v20 }
 0x42d   :  { %2159 = vmatprep.mubr.msk.bf16.mxu0 %vm2261_vm1, %v2260_v5  ;;  %2152 = vmatpush3.bf16.msra.mxu0 %v2215_v23 }
 0x42e   :  { %2153 = vmatprep.subr.bf16.mxu0 %v2260_v5 }
 0x431   :  { %2154 = vmatpush3.bf16.msra.mxu0 %v2216_v26 }
 0x432   :  { %2155 = vmatprep.subr.bf16.mxu0 %v2260_v5 }
 0x435   :  { %2156 = vmatpush3.bf16.msra.mxu0 %v2217_v32  ;;  %v2537_v32 = vsub.s32 2, %v1537_v9 }
 0x436   :  { %2157 = vmatprep.subr.bf16.mxu0 %v2260_v5  ;;  %v2222_v5 = vld [vmem:[%s2628_s0] sm:$0xff]  }
 0x437   :  { %1913 = vmatmul.mubr.msk.bf16.vlgmr.msra.gmra.mxu1 %vm90_vm0, %v2222_v5 }
 0x438   :  { %1500 = vmatpush1.bf16.msra.mxu1 %v2223_v33  ;;  %1523 = vmatprep.mubr.bf16.mxu1 %v2262_v30 }
 0x439   :  { %2158 = vmatpush3.bf16.msra.mxu0 %v2218_v27  ;;  %1501 = vmatprep.subr.bf16.mxu1 %v2228_v52 }
 0x43c   :  { %1502 = vmatpush1.bf16.msra.mxu1 %v2226_v53 }
 0x43d   :  { %1503 = vmatprep.subr.bf16.mxu1 %v2231_v54 }
 0x440   :  { %1504 = vmatpush1.bf16.msra.mxu1 %v2229_v55 }
 0x441   :  { %1505 = vmatprep.subr.bf16.mxu1 %v2234_v56 }
 0x444   :  { %1506 = vmatpush1.bf16.msra.mxu1 %v2232_v36 }
 0x4dc   :  { %v1222_v34 = vpop.f32.mrf.mxu1 }
 0x4de   :  { %v2143_v35 = vpop.f32.mrf.mxu1 }
 0x4e0   :  { %v1225_v37 = vpop.f32.mrf.mxu1 }
 0x4e2   :  { %v2144_v38 = vpop.f32.mrf.mxu1 }
 0x4e4   :  { %v1090_v39 = vpop.f32.mrf.mxu0 }
 0x4e5   :  { %v1097_v40 = vadd.f32 %v1090_v39, %v965_v11  ;;  %v2519_v11 = vsub.s32 0, %v1537_v9 }
 0x4e6   :  { %v2125_v41 = vpop.f32.mrf.mxu0 }
 0x4e7   :  { %v1229_v42 = vadd.f32 %v1222_v34, %v1097_v40  ;;  %v1539_v15 = vrot.slane %v1534_v12, %v2519_v11  ;;  %v2551_v34 = vsub.s32 7, %v1537_v9 }
 0x4e8   :  { %v1093_v43 = vpop.f32.mrf.mxu0 }
 0x4e9   :  { %v1098_v44 = vadd.f32 %v1093_v43, %v966_v18  ;;  %v2528_v18 = vrot.slane %v1534_v12, %v2524_v13 }
 0x4ea   :  { %v2126_v45 = vpop.f32.mrf.mxu0 }
 0x4eb   :  { %v1230_v46 = vadd.f32 %v1225_v37, %v1098_v44 }
 0x4ec   :  { %v1276_v47 = vpop.f32.mrf.mxu0 }
 0x4ee   :  { %v2149_v48 = vpop.f32.mrf.mxu0 }
 0x4f0   :  { %v1279_v49 = vpop.f32.mrf.mxu0 }
 0x4f1   :  { %v1283_v50 = vpack.c.bf16 %v1279_v49, %v1276_v47 }
 0x4f2   :  { %v2150_v51 = vpop.f32.mrf.mxu0 }
 0x4f3   :  { %2160 = vmatmul.mubr.msk.bf16.vlgmr.msra.gmra.mxu0 %vm326_vm2, %v1283_v50 }
 0x4f7   :  { %v1439_v6 = vpop.f32.mrf.mxu1 }
 0x4f9   :  { %v1441_v8 = vpop.f32.mrf.mxu1 }
 0x4fb   :  { %v1443_v10 = vpop.f32.mrf.mxu1 }
 0x4fd   :  { %v1445_v14 = vpop.f32.mrf.mxu1 }
 0x5b3   :  { %v1354_v57 = vpop.f32.mrf.mxu0 }
 0x5b4   :  { %v1361_v58 = vadd.f32 %v1354_v57, %v1229_v42 }
 0x5b5   :  { %v2161_v60 = vpop.f32.mrf.mxu0 }
 0x5b6   :  { %v1370_v62 = vadd.f32 %v1909_v59, %v1361_v58 }
 0x5b7   :  { %v1357_v61 = vpop.f32.mrf.mxu0 }
 0x5b8   :  { %v1362_v63 = vadd.f32 %v1357_v61, %v1230_v46  ;;  %v1372_v2 = vmax.f32 %v1370_v62, 0.0 }
 0x5b9   :  { %v2162_v0 = vpop.f32.mrf.mxu0 }
 0x5ba   :  { %v1371_v1 = vadd.f32 %v1909_v59, %v1362_v63 }
 0x5bc   :  { %v1373_v3 = vmax.f32 %v1371_v1, 0.0 }
 0x5be   :  { %v1374_v4 = vpack.c.bf16 %v1373_v3, %v1372_v2 }
 0x5c0   :  { %1922 = vmatmul.mubr.msk.bf16.vlgmr.msra.gmra.mxu1 %vm326_vm2, %v1374_v4 }
 0x680   :  { %v1525_v16 = vpop.f32.mrf.mxu1 }
 0x681   :  { %v1526_v17 = vadd.f32 %v1525_v16, %v1439_v6 }
 0x682   :  { %v1527_v19 = vpop.f32.mrf.mxu1 }
 0x683   :  { %v1546_v21 = vadd.f32 %v1539_v15, %v1526_v17  ;;  %v1528_v22 = vadd.f32 %v1527_v19, %v1441_v8 }
 0x684   :  { %v1529_v20 = vpop.f32.mrf.mxu1 }
 0x685   :  { %v2534_v23 = vmax.f32 %v1546_v21, 0.0  ;;  %v1547_v26 = vadd.f32 %v2528_v18, %v1528_v22  ;;  %v1530_v27 = vadd.f32 %v1529_v20, %v1443_v10 }
 0x686   :  { %v1531_v60 = vpop.f32.mrf.mxu1 }
 0x687   :  { %v1617_v29 = vrot.slane %v2534_v23, %v2530_v24  ;;  %v1629_v30 = vrot.slane %v2534_v23, %v2532_v25  ;;  %v2547_v5 = vmax.f32 %v1547_v26, 0.0  ;;  %v1557_v33 = vrot.slane %v2534_v23, %v2519_v11 }
 0x688   :  { %v1569_v35 = vrot.slane %v2534_v23, %v2524_v13  ;;  %v1587_v37 = vrot.slane %v2534_v23, %v2537_v32  ;;  %v1548_v40 = vadd.f32 %v1539_v15, %v1530_v27  ;;  %v1599_v41 = vrot.slane %v2534_v23, %v2539_v28 }
 0x689   :  { %v1634_v38 = vmul.f32 %v1629_v30, %v2534_v23  ;;  %v1573_v39 = vrot.slane %v2547_v5, %v2524_v13  ;;  %v1561_v42 = vrot.slane %v2547_v5, %v2519_v11  ;;  %v1633_v44 = vrot.slane %v2547_v5, %v2532_v25 }
 0x68a   :  { %v1574_v43 = vmul.f32 %v1569_v35, %v2534_v23  ;;  %v1622_v45 = vmul.f32 %v1617_v29, %v2534_v23  ;;  %v1647_v47 = vrot.slane %v2534_v23, %v2545_v31  ;;  %v1562_v49 = vmul.f32 %v1557_v33, %v2534_v23 }
 0x68b   :  { %v1638_v46 = vrot.slane %v1634_v38, 4  ;;  %v1575_v48 = vmul.f32 %v1573_v39, %v2547_v5  ;;  %v1659_v50 = vrot.slane %v2534_v23, %v2551_v34  ;;  %v1621_v52 = vrot.slane %v2547_v5, %v2530_v24 }
 0x68c   :  { %v1578_v51 = vrot.slane %v1574_v43, 4  ;;  %v1591_v54 = vrot.slane %v2547_v5, %v2537_v32  ;;  %v1603_v55 = vrot.slane %v2547_v5, %v2539_v28  ;;  %v1552_v56 = vmax.f32 %v1548_v40, 0.0 }
 0x68d   :  { %v1642_v53 = vadd.f32 %v1638_v46, %v1622_v45  ;;  %v1563_v36 = vmul.f32 %v1561_v42, %v2547_v5  ;;  %v1635_v58 = vmul.f32 %v1633_v44, %v2547_v5  ;;  %v1651_v59 = vrot.slane %v2547_v5, %v2545_v31 }
 0x68e   :  { %v1582_v57 = vadd.f32 %v1578_v51, %v1562_v49  ;;  %v1579_v61 = vrot.slane %v1575_v48, 4  ;;  %v1592_v62 = vmul.f32 %v1587_v37, %v1552_v56  ;;  %v1604_v63 = vmul.f32 %v1599_v41, %v1552_v56 }
 0x68f   :  { %v1652_v0 = vmul.f32 %v1647_v47, %v1552_v56  ;;  %v1623_v1 = vmul.f32 %v1621_v52, %v2547_v5  ;;  %v1664_v2 = vmul.f32 %v1659_v50, %v1552_v56  ;;  %v1677_v3 = vrot.slane %v1552_v56, %v2519_v11 }
 0x690   :  { %v1689_v4 = vrot.slane %v1552_v56, %v2524_v13  ;;  %v1594_v6 = vadd.f32 %v1592_v62, %v1582_v57  ;;  %v1608_v7 = vrot.slane %v1604_v63, 4  ;;  %v1532_v9 = vadd.f32 %v1531_v60, %v1445_v14 }
 0x691   :  { %v1654_v8 = vadd.f32 %v1652_v0, %v1642_v53  ;;  %v1668_v10 = vrot.slane %v1664_v2, 4  ;;  %v1707_v15 = vrot.slane %v1552_v56, %v2537_v32  ;;  %v1719_v16 = vrot.slane %v1552_v56, %v2539_v28 }
 0x692   :  { %v1694_v12 = vmul.f32 %v1689_v4, %v2534_v23  ;;  %v1583_v17 = vadd.f32 %v1579_v61, %v1563_v36  ;;  %v1639_v19 = vrot.slane %v1635_v58, 4  ;;  %v1737_v21 = vrot.slane %v1552_v56, %v2530_v24 }
 0x693   :  { %v1749_v22 = vrot.slane %v1552_v56, %v2532_v25  ;;  %v1612_v20 = vadd.f32 %v1608_v7, %v1594_v6  ;;  %v1672_v26 = vadd.f32 %v1668_v10, %v1654_v8  ;;  %v1682_v27 = vmul.f32 %v1677_v3, %v2534_v23 }
 0x694   :  { %v1698_v29 = vrot.slane %v1694_v12, 4  ;;  %v1767_v30 = vrot.slane %v1552_v56, %v2545_v31  ;;  %v1779_v33 = vrot.slane %v1552_v56, %v2551_v34  ;;  %v1549_v35 = vadd.f32 %v2528_v18, %v1532_v9 }
 0x695   :  { %v1754_v14 = vmul.f32 %v1749_v22, %v2534_v23  ;;  %v1712_v38 = vmul.f32 %v1707_v15, %v1552_v56  ;;  %v1724_v39 = vmul.f32 %v1719_v16, %v1552_v56  ;;  %v1796_v40 = vrot.slane %v1672_v26, 4 }
 0x696   :  { %v1702_v37 = vadd.f32 %v1698_v29, %v1682_v27  ;;  %v1742_v41 = vmul.f32 %v1737_v21, %v2534_v23  ;;  %v1784_v43 = vmul.f32 %v1779_v33, %v1552_v56  ;;  %v1553_v44 = vmax.f32 %v1549_v35, 0.0 }
 0x697   :  { %v1758_v42 = vrot.slane %v1754_v14, 4  ;;  %v1643_v45 = vadd.f32 %v1639_v19, %v1623_v1  ;;  %v1663_v46 = vrot.slane %v2547_v5, %v2551_v34  ;;  %v1807_v48 = vsel %vm1806_vm3, %v1612_v20, %v1796_v40 }
 0x698   :  { %v1714_v47 = vadd.f32 %v1712_v38, %v1702_v37  ;;  %v1772_v50 = vmul.f32 %v1767_v30, %v1552_v56  ;;  %1811 = vst [vmem:[%s2637_s9] sm:$0xff] %v1807_v48  ;;  %v1593_v18 = vmul.f32 %v1591_v54, %v1553_v44  ;;  %v1605_v51 = vmul.f32 %v1603_v55, %v1553_v44 }
 0x699   :  { %v1762_v49 = vadd.f32 %v1758_v42, %v1742_v41  ;;  %v1728_v52 = vrot.slane %v1724_v39, 4  ;;  %v1653_v23 = vmul.f32 %v1651_v59, %v1553_v44  ;;  %v1665_v53 = vmul.f32 %v1663_v46, %v1553_v44 }
 0x69a   :  { %v1681_v36 = vrot.slane %v1553_v44, %v2519_v11  ;;  %v1788_v58 = vrot.slane %v1784_v43, 4  ;;  %v1595_v60 = vadd.f32 %v1593_v18, %v1583_v17  ;;  %v1693_v61 = vrot.slane %v1553_v44, %v2524_v13 }
 0x69b   :  { %v1774_v57 = vadd.f32 %v1772_v50, %v1762_v49  ;;  %v1732_v62 = vadd.f32 %v1728_v52, %v1714_v47  ;;  %v1655_v63 = vadd.f32 %v1653_v23, %v1643_v45  ;;  %v1669_v0 = vrot.slane %v1665_v53, 4 }
 0x69c   :  { %v1609_v1 = vrot.slane %v1605_v51, 4  ;;  %v1683_v2 = vmul.f32 %v1681_v36, %v2547_v5  ;;  %v1695_v54 = vmul.f32 %v1693_v61, %v2547_v5  ;;  %v1711_v59 = vrot.slane %v1553_v44, %v2537_v32 }
 0x69d   :  { %v1792_v56 = vadd.f32 %v1788_v58, %v1774_v57  ;;  %v1673_v55 = vadd.f32 %v1669_v0, %v1655_v63  ;;  %v1741_v3 = vrot.slane %v1553_v44, %v2530_v24  ;;  %v1753_v11 = vrot.slane %v1553_v44, %v2532_v25 }
 0x69e   :  { %v1613_v6 = vadd.f32 %v1609_v1, %v1595_v60  ;;  %v1699_v7 = vrot.slane %v1695_v54, 4  ;;  %v1723_v13 = vrot.slane %v1553_v44, %v2539_v28  ;;  %v1771_v9 = vrot.slane %v1553_v44, %v2545_v31 }
 0x69f   :  { %v1802_v4 = vrot.slane %v1792_v56, 4  ;;  %v1755_v8 = vmul.f32 %v1753_v11, %v2547_v5  ;;  %v1783_v10 = vrot.slane %v1553_v44, %v2551_v34  ;;  %v1797_v12 = vrot.slane %v1673_v55, 4 }
 0x6a0   :  { %v1743_v32 = vmul.f32 %v1741_v3, %v2547_v5  ;;  %v1703_v24 = vadd.f32 %v1699_v7, %v1683_v2  ;;  %v1713_v31 = vmul.f32 %v1711_v59, %v1553_v44  ;;  %v1725_v34 = vmul.f32 %v1723_v13, %v1553_v44 }
 0x6a1   :  { %v1809_v15 = vsel %vm1806_vm3, %v1732_v62, %v1802_v4  ;;  %v1759_v25 = vrot.slane %v1755_v8, 4  ;;  %v1785_v16 = vmul.f32 %v1783_v10, %v1553_v44  ;;  %v1808_v28 = vsel %vm1806_vm3, %v1613_v6, %v1797_v12 }
 0x6a2   :  { %1813 = vst [vmem:[%s2637_s9 + $0x10] sm:$0xff] %v1809_v15  ;;  %1812 = vst [vmem:[%s2637_s9 + $0x8] sm:$0xff] %v1808_v28  ;;  %v1773_v19 = vmul.f32 %v1771_v9, %v1553_v44  ;;  %v1715_v21 = vadd.f32 %v1713_v31, %v1703_v24  ;;  %v1729_v20 = vrot.slane %v1725_v34, 4 }
 0x6a3   :  { %v1763_v17 = vadd.f32 %v1759_v25, %v1743_v32  ;;  %v1789_v5 = vrot.slane %v1785_v16, 4 }
 0x6a4   :  { %v1733_v27 = vadd.f32 %v1729_v20, %v1715_v21 }
 0x6a5   :  { %v1775_v22 = vadd.f32 %v1773_v19, %v1763_v17 }
 0x6a7   :  { %v1793_v26 = vadd.f32 %v1789_v5, %v1775_v22 }
 0x6a9   :  { %v1803_v29 = vrot.slane %v1793_v26, 4 }
 0x6ab   :  { %v1810_v14 = vsel %vm1806_vm3, %v1733_v27, %v1803_v29 }
 0x6ac   :  { %1814 = vst [vmem:[%s2637_s9 + $0x18] sm:$0xff] %v1810_v14 }
 0x6ad   :  { %1819 = vsyncpa [#allocation3], 1 }

</bundles_post_ra>
